<compile_context>
chip_gen: v7x
topology: tpu7x:2x2x1
jax: 0.10.0
libtpu: 0.0.40
codegen_flags: <defaults>
</compile_context>

<pallas_src>
import functools

import jax
import jax.numpy as jnp
from jax.experimental import pallas as pl
from jax.experimental.pallas import tpu as pltpu


def _round_up(x, m):
    return (x + m - 1) // m * m


def _value_kernel(x_ref, w1_ref, b1_ref, w2_ref, b2_ref, w3_ref, b3_ref, o_ref):
    # fc1: (TB, K) @ (K, F1) on the MXU (bf16 in, f32 acc); bias + ReLU in f32
    # (v5e's VPU has no bf16 path, and f32 keeps the head accurate).
    x = x_ref[...].astype(jnp.bfloat16)
    h1 = jnp.dot(x, w1_ref[...], preferred_element_type=jnp.float32)
    h1 = jnp.maximum(h1 + b1_ref[...], 0.0)

    # fc2: (TB, F1) @ (F1, F2) on the MXU (bf16 in, f32 acc), bias + ReLU in f32.
    h2 = jnp.dot(h1.astype(jnp.bfloat16), w2_ref[...],
                 preferred_element_type=jnp.float32)
    h2 = jnp.maximum(h2 + b2_ref[...], 0.0)

    # v head (output width 1): VPU broadcast-multiply + cross-lane sum (XLU)
    # instead of a degenerate N=1 MXU matmul.  b3 is a scalar read from SMEM.
    v = jnp.sum(h2 * w3_ref[...], axis=-1, keepdims=True) + b3_ref[0]   # (TB, 1)

    # Lane-dense packed store: relayout the (TB, 1) column into a
    # (TB//128, 128) slab (sublane->lane reshape), so HBM writeback is
    # 4 B per batch row instead of a 512 B broadcast row.
    o_ref[...] = v.reshape(o_ref.shape).astype(o_ref.dtype)


def _choose_batch_tile(batch, block_b):
    """Per-grid-step batch tile; always a multiple of 128."""
    if batch <= 1024:
        # Single grid step with minimal padding; splitting further would be
        # pure per-step overhead (~0.35 us/step) at this size.
        return _round_up(max(batch, 1), 128)
    # Multi-step grid: tile is a multiple of 1024 so the packed output block
    # (tb//128, 128) keeps an (8, 128)-aligned sublane count; capped near B/4
    # so the grid keeps >= ~4 steps (feeds both v7x TensorCores and pipelines
    # the state DMA against compute), and capped by block_b (VMEM budget).
    cap = max(1024, (block_b // 1024) * 1024)
    target = max(1024, _round_up(-(-batch // 4), 1024))
    return min(cap, target)


def prepare_value_params(w1, b1, w2, b2, w3, b3):
    """One-time parameter packing, hoisted out of the per-call hot path:
    bf16 weights for the MXU, f32 bias rows, v-head as a (1, F2) row, and the
    scalar output bias as a (1,) f32 array destined for SMEM.

    Weights are stored transposed vs. PyTorch, i.e. (fan_in, fan_out)."""
    f1 = w1.shape[1]
    f2 = w2.shape[1]
    return (
        w1.astype(jnp.bfloat16),
        jnp.asarray(b1, jnp.float32).reshape(1, f1),
        w2.astype(jnp.bfloat16),
        jnp.asarray(b2, jnp.float32).reshape(1, f2),
        jnp.asarray(w3, jnp.float32).reshape(1, f2),
        jnp.asarray(b3, jnp.float32).reshape((1,)),
    )


@functools.partial(jax.jit, static_argnames=("block_b",))
def value_network_forward(state, params, *, block_b=4096):
    """Fused SAC value network.  state: (B, D_in) f32 -> (B, 1) f32."""
    w1_bf, b1_row, w2_bf, b2_row, w3_row, b3_s = params
    B, d_in = state.shape
    f1 = w1_bf.shape[1]
    f2 = w2_bf.shape[1]

    tb = _choose_batch_tile(B, block_b)
    b_pad = _round_up(B, tb)
    if b_pad != B:  # skip the pad op entirely when B is already a tile multiple
        state = jnp.pad(state, ((0, b_pad - B), (0, 0)))

    grid = (b_pad // tb,)
    out = pl.pallas_call(
        _value_kernel,
        out_shape=jax.ShapeDtypeStruct((b_pad // 128, 128), jnp.float32),
        grid=grid,
        in_specs=[
            pl.BlockSpec((tb, d_in), lambda i: (i, 0)),   # state tile (streamed)
            pl.BlockSpec((d_in, f1), lambda i: (0, 0)),   # w1 (VMEM-resident)
            pl.BlockSpec((1, f1), lambda i: (0, 0)),      # b1 row (resident)
            pl.BlockSpec((f1, f2), lambda i: (0, 0)),     # w2 (VMEM-resident)
            pl.BlockSpec((1, f2), lambda i: (0, 0)),      # b2 row (resident)
            pl.BlockSpec((1, f2), lambda i: (0, 0)),      # w3 row (resident)
            pl.BlockSpec(memory_space=pltpu.SMEM),        # b3 scalar in SMEM
        ],
        out_specs=pl.BlockSpec((tb // 128, 128), lambda i: (i, 0)),
        compiler_params=pltpu.CompilerParams(
            dimension_semantics=("parallel",)),
    )(state, w1_bf, b1_row, w2_bf, b2_row, w3_row, b3_s)

    # Packed slab is batch-row-major -> contiguous unpack, then drop padding.
    return out.reshape(-1)[:B, None]


def init_linear(key, fan_in, fan_out):
    """Deterministic init mimicking torch.nn.Linear defaults:
    W, b ~ U(-1/sqrt(fan_in), 1/sqrt(fan_in)).  Weight stored as (fan_in, fan_out)."""
    kw, kb = jax.random.split(key)
    bound = 1.0 / jnp.sqrt(jnp.float32(fan_in))
    w = jax.random.uniform(kw, (fan_in, fan_out), jnp.float32, -bound, bound)
    b = jax.random.uniform(kb, (1, fan_out), jnp.float32, -bound, bound)
    return w, b


if __name__ == "__main__":
    # Small shapes consistent with the module: input_dims=(8,), fc1=fc2=256.
    batch = 8
    input_dims = 8
    fc1_dims = 256
    fc2_dims = 256

    key = jax.random.PRNGKey(0)
    k_x, k1, k2, k3 = jax.random.split(key, 4)

    state = jax.random.normal(k_x, (batch, input_dims), jnp.float32)
    w1, b1 = init_linear(k1, input_dims, fc1_dims)
    w2, b2 = init_linear(k2, fc1_dims, fc2_dims)
    w3, b3 = init_linear(k3, fc2_dims, 1)

    # One-time parameter prep (hoisted out of the forward hot path).
    params = prepare_value_params(w1, b1, w2, b2, w3, b3)

    v = jax.block_until_ready(value_network_forward(state, params))
    assert v.shape == (batch, 1)

    # Full-f32 reference (original module semantics); loose tolerance covers the
    # bf16 MXU inputs (f32 accumulation keeps the error tiny at these widths).
    h1 = jnp.maximum(state @ w1 + b1, 0.0)
    h2 = jnp.maximum(h1 @ w2 + b2, 0.0)
    v_ref = h2 @ w3 + b3
    assert jnp.allclose(v, v_ref, atol=2e-2, rtol=2e-2), (v, v_ref)

    # bf16-matmul-matched reference (tight check of the kernel arithmetic).
    h1b = jnp.maximum(
        jnp.dot(state.astype(jnp.bfloat16), w1.astype(jnp.bfloat16),
                preferred_element_type=jnp.float32) + b1, 0.0)
    h2b = jnp.maximum(
        jnp.dot(h1b.astype(jnp.bfloat16), w2.astype(jnp.bfloat16),
                preferred_element_type=jnp.float32) + b2, 0.0)
    v_ref_bf = jnp.sum(h2b * w3.reshape(1, -1), axis=-1, keepdims=True) + b3
    assert jnp.allclose(v, v_ref_bf, atol=1e-3, rtol=1e-3), (v, v_ref_bf)

    # Exercise the multi-step grid + batch padding path (B=3000 -> 3 steps of 1024).
    big_state = jax.random.normal(k_x, (3000, input_dims), jnp.float32)
    v_big = jax.block_until_ready(value_network_forward(big_state, params))
    h1 = jnp.maximum(big_state @ w1 + b1, 0.0)
    h2 = jnp.maximum(h1 @ w2 + b2, 0.0)
    v_big_ref = h2 @ w3 + b3
    assert v_big.shape == (3000, 1)
    assert jnp.allclose(v_big, v_big_ref, atol=2e-2, rtol=2e-2)

    print("KERNEL_OK")
</pallas_src>

<mosaic_0001>
module attributes {stable_mosaic.version = 11 : i64} {
  func.func @_value_kernel(%arg0: i32, %arg1: memref<128x8xf32, #tpu.memory_space<vmem>>, %arg2: memref<8x256xbf16, #tpu.memory_space<vmem>>, %arg3: memref<1x256xf32, #tpu.memory_space<vmem>>, %arg4: memref<256x256xbf16, #tpu.memory_space<vmem>>, %arg5: memref<1x256xf32, #tpu.memory_space<vmem>>, %arg6: memref<1x256xf32, #tpu.memory_space<vmem>>, %arg7: memref<1xf32, #tpu.memory_space<smem>>, %arg8: memref<1x128xf32, #tpu.memory_space<vmem>>) attributes {dimension_semantics = [#tpu.dimension_semantics<parallel>], iteration_bounds = array<i64: 1>, scalar_prefetch = 0 : i64, scratch_operands = 0 : i64, tpu.core_type = #tpu.core_type<tc>, window_params = [{transform_indices = @transform_0, window_bounds = array<i64: 128, 8>}, {pipeline_mode = #tpu.pipeline_mode<synchronous>, transform_indices = @transform_1, window_bounds = array<i64: 8, 256>}, {pipeline_mode = #tpu.pipeline_mode<synchronous>, transform_indices = @transform_2, window_bounds = array<i64: 1, 256>}, {pipeline_mode = #tpu.pipeline_mode<synchronous>, transform_indices = @transform_3, window_bounds = array<i64: 256, 256>}, {pipeline_mode = #tpu.pipeline_mode<synchronous>, transform_indices = @transform_4, window_bounds = array<i64: 1, 256>}, {pipeline_mode = #tpu.pipeline_mode<synchronous>, transform_indices = @transform_5, window_bounds = array<i64: 1, 256>}, {transform_indices = @transform_6, window_bounds = array<i64: 1>}, {transform_indices = @transform_7, window_bounds = array<i64: 1, 128>}]} {
    %c0 = arith.constant 0 : index
    %c0_0 = arith.constant 0 : index
    %0 = vector.load %arg1[%c0, %c0_0] : memref<128x8xf32, #tpu.memory_space<vmem>>, vector<128x8xf32>
    %1 = arith.truncf %0 : vector<128x8xf32> to vector<128x8xbf16>
    %c0_1 = arith.constant 0 : index
    %c0_2 = arith.constant 0 : index
    %2 = vector.load %arg2[%c0_1, %c0_2] : memref<8x256xbf16, #tpu.memory_space<vmem>>, vector<8x256xbf16>
    %cst = arith.constant dense<0.000000e+00> : vector<128x256xf32>
    %3 = tpu.matmul %1, %2, %cst {dimension_numbers = #tpu.dot_dimension_numbers<[1], [0], [0], [1], [0, 0, 1, 1], [], []>} : vector<128x8xbf16>, vector<8x256xbf16>, vector<128x256xf32> -> vector<128x256xf32>
    %c0_3 = arith.constant 0 : index
    %c0_4 = arith.constant 0 : index
    %4 = vector.load %arg3[%c0_3, %c0_4] : memref<1x256xf32, #tpu.memory_space<vmem>>, vector<1x256xf32>
    %5 = vector.broadcast %4 : vector<1x256xf32> to vector<128x256xf32>
    %6 = arith.addf %3, %5 : vector<128x256xf32>
    %cst_5 = arith.constant 0.000000e+00 : f32
    %7 = vector.broadcast %cst_5 : f32 to vector<128x256xf32>
    %8 = arith.maximumf %6, %7 : vector<128x256xf32>
    %9 = arith.truncf %8 : vector<128x256xf32> to vector<128x256xbf16>
    %c0_6 = arith.constant 0 : index
    %c0_7 = arith.constant 0 : index
    %10 = vector.load %arg4[%c0_6, %c0_7] : memref<256x256xbf16, #tpu.memory_space<vmem>>, vector<256x256xbf16>
    %cst_8 = arith.constant dense<0.000000e+00> : vector<128x256xf32>
    %11 = tpu.matmul %9, %10, %cst_8 {dimension_numbers = #tpu.dot_dimension_numbers<[1], [0], [0], [1], [0, 0, 1, 1], [], []>} : vector<128x256xbf16>, vector<256x256xbf16>, vector<128x256xf32> -> vector<128x256xf32>
    %c0_9 = arith.constant 0 : index
    %c0_10 = arith.constant 0 : index
    %12 = vector.load %arg5[%c0_9, %c0_10] : memref<1x256xf32, #tpu.memory_space<vmem>>, vector<1x256xf32>
    %13 = vector.broadcast %12 : vector<1x256xf32> to vector<128x256xf32>
    %14 = arith.addf %11, %13 : vector<128x256xf32>
    %cst_11 = arith.constant 0.000000e+00 : f32
    %15 = vector.broadcast %cst_11 : f32 to vector<128x256xf32>
    %16 = arith.maximumf %14, %15 : vector<128x256xf32>
    %c0_12 = arith.constant 0 : index
    %c0_13 = arith.constant 0 : index
    %17 = vector.load %arg6[%c0_12, %c0_13] : memref<1x256xf32, #tpu.memory_space<vmem>>, vector<1x256xf32>
    %18 = vector.broadcast %17 : vector<1x256xf32> to vector<128x256xf32>
    %19 = arith.mulf %16, %18 : vector<128x256xf32>
    %cst_14 = arith.constant dense<0.000000e+00> : vector<128xf32>
    %20 = vector.multi_reduction <add>, %19, %cst_14 [1] : vector<128x256xf32> to vector<128xf32>
    %21 = vector.shape_cast %20 : vector<128xf32> to vector<128x1xf32>
    %c0_15 = arith.constant 0 : index
    %22 = memref.load %arg7[%c0_15] : memref<1xf32, #tpu.memory_space<smem>>
    %23 = vector.broadcast %22 : f32 to vector<128x1xf32>
    %24 = arith.addf %21, %23 : vector<128x1xf32>
    %25 = vector.shape_cast %24 : vector<128x1xf32> to vector<1x128xf32>
    %c0_16 = arith.constant 0 : index
    %c0_17 = arith.constant 0 : index
    %26 = vector.load %arg8[%c0_16, %c0_17] : memref<1x128xf32, #tpu.memory_space<vmem>>, vector<1x128xf32>
    tpu.vector_store %arg8[%c0_16, %c0_17], %25 {strides = array<i32>} : memref<1x128xf32, #tpu.memory_space<vmem>>, vector<1x128xf32>,
    return
  }
  func.func @transform_0(%arg0: i32) -> (i32, i32) {
    %c0_i32 = arith.constant 0 : i32
    %c0_i32_0 = arith.constant 0 : i32
    return %arg0, %c0_i32 : i32, i32
  }
  func.func @transform_1(%arg0: i32) -> (i32, i32) {
    %c0_i32 = arith.constant 0 : i32
    %c0_i32_0 = arith.constant 0 : i32
    %c0_i32_1 = arith.constant 0 : i32
    return %c0_i32, %c0_i32_0 : i32, i32
  }
  func.func @transform_2(%arg0: i32) -> (i32, i32) {
    %c0_i32 = arith.constant 0 : i32
    %c0_i32_0 = arith.constant 0 : i32
    %c0_i32_1 = arith.constant 0 : i32
    return %c0_i32, %c0_i32_0 : i32, i32
  }
  func.func @transform_3(%arg0: i32) -> (i32, i32) {
    %c0_i32 = arith.constant 0 : i32
    %c0_i32_0 = arith.constant 0 : i32
    %c0_i32_1 = arith.constant 0 : i32
    return %c0_i32, %c0_i32_0 : i32, i32
  }
  func.func @transform_4(%arg0: i32) -> (i32, i32) {
    %c0_i32 = arith.constant 0 : i32
    %c0_i32_0 = arith.constant 0 : i32
    %c0_i32_1 = arith.constant 0 : i32
    return %c0_i32, %c0_i32_0 : i32, i32
  }
  func.func @transform_5(%arg0: i32) -> (i32, i32) {
    %c0_i32 = arith.constant 0 : i32
    %c0_i32_0 = arith.constant 0 : i32
    %c0_i32_1 = arith.constant 0 : i32
    return %c0_i32, %c0_i32_0 : i32, i32
  }
  func.func @transform_6(%arg0: i32) -> i32 {
    %c0_i32 = arith.constant 0 : i32
    %c0_i32_0 = arith.constant 0 : i32
    return %c0_i32 : i32
  }
  func.func @transform_7(%arg0: i32) -> (i32, i32) {
    %c0_i32 = arith.constant 0 : i32
    %c0_i32_0 = arith.constant 0 : i32
    return %arg0, %c0_i32 : i32, i32
  }
}

</mosaic_0001>

<bundles_post_ra>
// kernel: value_network_forward.1
= control target key start
LH: loop header
LB: loop body
LE: loop exit
PB: predicated region body
PF: predicated region fallthrough
CT: control target
= control target key end

     0   :  { %13 = vsyncpa [#allocation4], 0  ;;  %s1023_s24 = smov [#allocation3]   ;;  %s1341_s0 = inlined_call_operand.vmem [shape: f32[128,8], index: 0, kind: input, shape index: {}]   ;;  %s1342_s1 = inlined_call_operand.vmem [shape: bf16[8,256], index: 1, kind: input, shape index: {}]   ;;  %s1343_s2 = inlined_call_operand.vmem [shape: f32[1,256], index: 2, kind: input, shape index: {}]   ;;  %s1344_s3 = inlined_call_operand.hbm [shape: bf16[256,256], index: 3, kind: input, shape index: {}]   ;;  %s1345_s4 = inlined_call_operand.vmem [shape: f32[1,256], index: 4, kind: input, shape index: {}]   ;;  %s1346_s5 = inlined_call_operand.vmem [shape: f32[1,256], index: 5, kind: input, shape index: {}]   ;;  %s1347_s6 = inlined_call_operand.<no memory space> [shape: f32[1], index: 6, kind: input, shape index: {}]   ;;  %s1348_s7 = inlined_call_operand.vmem [shape: f32[1,128], index: 7, kind: output, shape index: {}]  }
   0x1   :  { %s25_s25 = sshll.u32 %s1023_s24, 4  ;;  %s999_s28 = scalar_lea.hbm %s1344_s3, 4096  ;;  %s26_s25 = int_to_ptr.vmem [resolvable:$true] %s25_s25 }
   0x2   :  { %p1000_p0 = scmp.ne.s32.totalorder %s1344_s3, %s999_s28  ;;  %p1003_p1 = scmp.lt.u32.totalorder %s999_s28, %s1344_s3 }
   0x4   :  { %p1005_p2 = pnand %p1003_p1, %p1000_p0 }
   0x6   :  { %1008 = shalt.err (!%p1005_p2)
}
   0x7   :  { %s1009_s10 = scalar_lea.vmem %s26_s25, 4096  ;;  %p1014_p4 = scmp.lt.s32.totalorder %s26_s25, %s26_s25 }
   0x8   :  { %p1010_p3 = scmp.ne.s32.totalorder %s26_s25, %s1009_s10  ;;  %p1015_p5 = scmp.lt.s32.totalorder %s1009_s10, %s1009_s10 }
   0xa   :  { %p1016_p6 = por %p1015_p5, %p1014_p4 }
   0xc   :  { %p1017_p7 = pnand %p1016_p6, %p1010_p3 }
   0xe   :  { %1020 = shalt.err (!%p1017_p7)
}
   0xf   :  { %s1024_s11 = smov 128   ;;  %s1025_s12 = smov 8  }
  0x10   :  { %31 = dma.hbm_to_vmem [thread:$0]  %s1344_s3, 4096, %s26_s25, [#allocation4], %s1024_s11, %s1024_s11, %s1025_s12  }
  0x11   :  { %1021 = dma.done.wait [#allocation4], 4096  }
  0x12   :  { %1022 = vsyncadd [#allocation4], 4294963200  ;;  %v1026_v0 = vmov 0   ;;  %v66_v1 = vld [vmem:[%s1342_s1] sm:$0xff]  ;;  %vm109_vm0 = vcmask 1043456   ;;  %v43_v3 = vld [vmem:[%s1341_s0 + $0x8] sm:$0xff]  ;;  %v69_v61 = vlaneseq }
  0x13   :  { %148 = vmatprep.mubr.bf16.mxu0 %v1026_v0  ;;  %v42_v2 = vld [vmem:[%s1341_s0] sm:$0xff]  ;;  %v871_v4 = vcombine.high %v66_v1, %v66_v1  ;;  %v870_v5 = vcombine.low %v66_v1, %v66_v1  ;;  %vm84_vm1 = vcmask 64512   ;;  %v44_v8 = vld [vmem:[%s1341_s0 + $0x10] sm:$0xff]  ;;  %v45_v11 = vld [vmem:[%s1341_s0 + $0x18] sm:$0xff]  ;;  %vm763_vm2 = vcmask 130112  }
  0x14   :  { %v58_v7 = vpack.c.bf16 %v43_v3, %v42_v2  ;;  %v951_v9 = vld [vmem:[#allocation3] ss:$8 sps:$4 sm:$0xff]   ;;  %v953_v10 = vld [vmem:[#allocation3 + $0x4] ss:$8 sps:$4 sm:$0xff]   ;;  %v956_v12 = vld [vmem:[#allocation3 + $0x14] ss:$8 sps:$4 sm:$0xff]   ;;  %v59_v15 = vpack.c.bf16 %v45_v11, %v44_v8 }
  0x15   :  { %872 = vmatprep.subr.msk.bf16.mxu0 %vm109_vm0, %v871_v4  ;;  %v111_v6 = vsel %vm109_vm0, %v870_v5, 0  ;;  %v954_v13 = vld [vmem:[#allocation3 + $0x10] ss:$8 sps:$4 sm:$0xff]   ;;  %913 = vmatprep.subr.bf16.mxu1 %v953_v10  ;;  %v959_v14 = vld [vmem:[#allocation3 + $0x24] ss:$8 sps:$4 sm:$0xff]   ;;  %v1147_v62 = vshrl.u32 %v69_v61, 7 }
  0x16   :  { %117 = vmatpush1.bf16.msra.mxu0 %v111_v6  ;;  %929 = vmatpush1.bf16.msra.mxu1 %v951_v9  ;;  %v957_v16 = vld [vmem:[#allocation3 + $0x20] ss:$8 sps:$4 sm:$0xff]   ;;  %v962_v17 = vld [vmem:[#allocation3 + $0x34] ss:$8 sps:$4 sm:$0xff]   ;;  %v960_v20 = vld [vmem:[#allocation3 + $0x30] ss:$8 sps:$4 sm:$0xff]  }
  0x17   :  { %481 = vmatprep.subr.bf16.mxu0 %v953_v10  ;;  %914 = vmatprep.subr.bf16.mxu1 %v956_v12  ;;  %v46_v18 = vld [vmem:[%s1341_s0 + $0x20] sm:$0xff]  ;;  %v47_v19 = vld [vmem:[%s1341_s0 + $0x28] sm:$0xff]  ;;  %v968_v24 = vld [vmem:[#allocation3 + $0x54] ss:$8 sps:$4 sm:$0xff]   ;;  %v1150_v63 = vsub.s32 0, %v1147_v62  ;;  %v1156_v1 = vsub.s32 1, %v1147_v62 }
  0x18   :  { %v965_v21 = vld [vmem:[#allocation3 + $0x44] ss:$8 sps:$4 sm:$0xff]   ;;  %v60_v22 = vpack.c.bf16 %v47_v19, %v46_v18  ;;  %v963_v23 = vld [vmem:[#allocation3 + $0x40] ss:$8 sps:$4 sm:$0xff]   ;;  %v48_v25 = vld [vmem:[%s1341_s0 + $0x30] sm:$0xff]  ;;  %vm770_vm3 = vcmask 195712  }
  0x19   :  { %873 = vmatmul.mubr.msk.bf16.vlgmr.msra.gmra.mrb[0].mxu0 %vm84_vm1, %v58_v7  ;;  %v49_v26 = vld [vmem:[%s1341_s0 + $0x38] sm:$0xff]  ;;  %v971_v28 = vld [vmem:[#allocation3 + $0x64] ss:$8 sps:$4 sm:$0xff]   ;;  %v969_v30 = vld [vmem:[#allocation3 + $0x60] ss:$8 sps:$4 sm:$0xff]   ;;  %vm777_vm4 = vcmask 261312  }
  0x1a   :  { %158 = vmatprep.mubr.bf16.mxu0 %v1026_v0  ;;  %482 = vmatpush1.bf16.msra.mxu0 %v951_v9  ;;  %v966_v27 = vld [vmem:[#allocation3 + $0x50] ss:$8 sps:$4 sm:$0xff]   ;;  %v61_v29 = vpack.c.bf16 %v49_v26, %v48_v25  ;;  %v974_v31 = vld [vmem:[#allocation3 + $0x74] ss:$8 sps:$4 sm:$0xff]   ;;  %v50_v32 = vld [vmem:[%s1341_s0 + $0x40] sm:$0xff]  ;;  %vm784_vm5 = vcmask 326912  }
  0x1b   :  { %483 = vmatprep.subr.bf16.mxu0 %v956_v12  ;;  %930 = vmatpush1.bf16.msra.mxu1 %v954_v13  ;;  %v51_v33 = vld [vmem:[%s1341_s0 + $0x48] sm:$0xff]  ;;  %v972_v34 = vld [vmem:[#allocation3 + $0x70] ss:$8 sps:$4 sm:$0xff]   ;;  %v980_v38 = vld [vmem:[#allocation3 + $0x94] ss:$8 sps:$4 sm:$0xff]   ;;  %vm791_vm6 = vcmask 392512  }
  0x1c   :  { %915 = vmatprep.subr.bf16.mxu1 %v959_v14  ;;  %v977_v35 = vld [vmem:[#allocation3 + $0x84] ss:$8 sps:$4 sm:$0xff]   ;;  %v62_v36 = vpack.c.bf16 %v51_v33, %v50_v32  ;;  %v975_v37 = vld [vmem:[#allocation3 + $0x80] ss:$8 sps:$4 sm:$0xff]   ;;  %v52_v39 = vld [vmem:[%s1341_s0 + $0x50] sm:$0xff]  ;;  %vm798_vm7 = vcmask 458112  }
  0x1d   :  { %v53_v40 = vld [vmem:[%s1341_s0 + $0x58] sm:$0xff]  ;;  %v983_v42 = vld [vmem:[#allocation3 + $0xa4] ss:$8 sps:$4 sm:$0xff]   ;;  %v981_v44 = vld [vmem:[#allocation3 + $0xa0] ss:$8 sps:$4 sm:$0xff]   ;;  %vm805_vm8 = vcmask 523712  }
  0x1e   :  { %484 = vmatpush1.bf16.msra.mxu0 %v954_v13  ;;  %v978_v41 = vld [vmem:[#allocation3 + $0x90] ss:$8 sps:$4 sm:$0xff]   ;;  %v63_v43 = vpack.c.bf16 %v53_v40, %v52_v39  ;;  %v986_v45 = vld [vmem:[#allocation3 + $0xb4] ss:$8 sps:$4 sm:$0xff]   ;;  %v54_v46 = vld [vmem:[%s1341_s0 + $0x60] sm:$0xff]  ;;  %vm812_vm9 = vcmask 589312  }
  0x1f   :  { %485 = vmatprep.subr.bf16.mxu0 %v959_v14  ;;  %931 = vmatpush1.bf16.msra.mxu1 %v957_v16  ;;  %v55_v47 = vld [vmem:[%s1341_s0 + $0x68] sm:$0xff]  ;;  %v984_v48 = vld [vmem:[#allocation3 + $0xb0] ss:$8 sps:$4 sm:$0xff]   ;;  %v992_v52 = vld [vmem:[#allocation3 + $0xd4] ss:$8 sps:$4 sm:$0xff]   ;;  %vm819_vm10 = vcmask 654912  }
  0x20   :  { %916 = vmatprep.subr.bf16.mxu1 %v962_v17  ;;  %v989_v49 = vld [vmem:[#allocation3 + $0xc4] ss:$8 sps:$4 sm:$0xff]   ;;  %v64_v50 = vpack.c.bf16 %v55_v47, %v54_v46  ;;  %v987_v51 = vld [vmem:[#allocation3 + $0xc0] ss:$8 sps:$4 sm:$0xff]   ;;  %v56_v53 = vld [vmem:[%s1341_s0 + $0x70] sm:$0xff]  ;;  %vm826_vm11 = vcmask 720512  }
  0x21   :  { %874 = vmatmul.mubr.msk.bf16.gmra.mrb[4].mxu0 %vm84_vm1, %v59_v15  ;;  %v57_v54 = vld [vmem:[%s1341_s0 + $0x78] sm:$0xff]  ;;  %v995_v57 = vld [vmem:[#allocation3 + $0xe4] ss:$8 sps:$4 sm:$0xff]   ;;  %v993_v58 = vld [vmem:[#allocation3 + $0xe0] ss:$8 sps:$4 sm:$0xff]   ;;  %vm833_vm12 = vcmask 786112  }
  0x22   :  { %168 = vmatprep.mubr.bf16.mxu0 %v1026_v0  ;;  %486 = vmatpush1.bf16.msra.mxu0 %v957_v16  ;;  %v990_v55 = vld [vmem:[#allocation3 + $0xd0] ss:$8 sps:$4 sm:$0xff]   ;;  %v65_v56 = vpack.c.bf16 %v57_v54, %v56_v53  ;;  %v998_v59 = vld [vmem:[#allocation3 + $0xf4] ss:$8 sps:$4 sm:$0xff]   ;;  %vm840_vm13 = vcmask 851712   ;;  %vm847_vm14 = vcmask 917312  }
  0x23   :  { %487 = vmatprep.subr.bf16.mxu0 %v962_v17  ;;  %932 = vmatpush1.bf16.msra.mxu1 %v960_v20  ;;  %v996_v60 = vld [vmem:[#allocation3 + $0xf0] ss:$8 sps:$4 sm:$0xff]   ;;  %vm854_vm15 = vcmask 982912   ;;  %vm861_vm0 = vcmask 1048512  }
  0x24   :  { %917 = vmatprep.subr.bf16.mxu1 %v965_v21 }
  0x26   :  { %488 = vmatpush1.bf16.msra.mxu0 %v960_v20 }
  0x27   :  { %489 = vmatprep.subr.bf16.mxu0 %v965_v21  ;;  %933 = vmatpush1.bf16.msra.mxu1 %v963_v23 }
  0x28   :  { %918 = vmatprep.subr.bf16.mxu1 %v968_v24 }
  0x29   :  { %875 = vmatmul.mubr.msk.bf16.gmra.mrb[8].mxu0 %vm84_vm1, %v60_v22 }
  0x2a   :  { %178 = vmatprep.mubr.bf16.mxu0 %v1026_v0  ;;  %490 = vmatpush1.bf16.msra.mxu0 %v963_v23 }
  0x2b   :  { %491 = vmatprep.subr.bf16.mxu0 %v968_v24  ;;  %934 = vmatpush1.bf16.msra.mxu1 %v966_v27 }
  0x2c   :  { %919 = vmatprep.subr.bf16.mxu1 %v971_v28 }
  0x2e   :  { %492 = vmatpush1.bf16.msra.mxu0 %v966_v27 }
  0x2f   :  { %493 = vmatprep.subr.bf16.mxu0 %v971_v28  ;;  %935 = vmatpush1.bf16.msra.mxu1 %v969_v30 }
  0x30   :  { %920 = vmatprep.subr.bf16.mxu1 %v974_v31 }
  0x31   :  { %876 = vmatmul.mubr.msk.bf16.gmra.mrb[12].mxu0 %vm84_vm1, %v61_v29 }
  0x32   :  { %188 = vmatprep.mubr.bf16.mxu0 %v1026_v0  ;;  %494 = vmatpush1.bf16.msra.mxu0 %v969_v30 }
  0x33   :  { %495 = vmatprep.subr.bf16.mxu0 %v974_v31  ;;  %936 = vmatpush1.bf16.msra.mxu1 %v972_v34 }
  0x34   :  { %921 = vmatprep.subr.bf16.mxu1 %v977_v35 }
  0x36   :  { %496 = vmatpush1.bf16.msra.mxu0 %v972_v34 }
  0x37   :  { %497 = vmatprep.subr.bf16.mxu0 %v977_v35  ;;  %937 = vmatpush1.bf16.msra.mxu1 %v975_v37 }
  0x38   :  { %922 = vmatprep.subr.bf16.mxu1 %v980_v38 }
  0x39   :  { %877 = vmatmul.mubr.msk.bf16.gmra.mrb[16].mxu0 %vm84_vm1, %v62_v36 }
  0x3a   :  { %198 = vmatprep.mubr.bf16.mxu0 %v1026_v0  ;;  %498 = vmatpush1.bf16.msra.mxu0 %v975_v37 }
  0x3b   :  { %499 = vmatprep.subr.bf16.mxu0 %v980_v38  ;;  %938 = vmatpush1.bf16.msra.mxu1 %v978_v41 }
  0x3c   :  { %923 = vmatprep.subr.bf16.mxu1 %v983_v42 }
  0x3e   :  { %500 = vmatpush1.bf16.msra.mxu0 %v978_v41 }
  0x3f   :  { %501 = vmatprep.subr.bf16.mxu0 %v983_v42  ;;  %939 = vmatpush1.bf16.msra.mxu1 %v981_v44 }
  0x40   :  { %924 = vmatprep.subr.bf16.mxu1 %v986_v45 }
  0x41   :  { %878 = vmatmul.mubr.msk.bf16.gmra.mrb[20].mxu0 %vm84_vm1, %v63_v43 }
  0x42   :  { %208 = vmatprep.mubr.bf16.mxu0 %v1026_v0  ;;  %502 = vmatpush1.bf16.msra.mxu0 %v981_v44 }
  0x43   :  { %503 = vmatprep.subr.bf16.mxu0 %v986_v45  ;;  %940 = vmatpush1.bf16.msra.mxu1 %v984_v48 }
  0x44   :  { %925 = vmatprep.subr.bf16.mxu1 %v989_v49 }
  0x46   :  { %504 = vmatpush1.bf16.msra.mxu0 %v984_v48 }
  0x47   :  { %505 = vmatprep.subr.bf16.mxu0 %v989_v49  ;;  %941 = vmatpush1.bf16.msra.mxu1 %v987_v51 }
  0x48   :  { %926 = vmatprep.subr.bf16.mxu1 %v992_v52 }
  0x49   :  { %879 = vmatmul.mubr.msk.bf16.gmra.mrb[24].mxu0 %vm84_vm1, %v64_v50 }
  0x4a   :  { %218 = vmatprep.mubr.bf16.mxu0 %v1026_v0  ;;  %506 = vmatpush1.bf16.msra.mxu0 %v987_v51  ;;  %v67_v0 = vld [vmem:[%s1343_s2] sm:$0x3] }
  0x4b   :  { %507 = vmatprep.subr.bf16.mxu0 %v992_v52  ;;  %942 = vmatpush1.bf16.msra.mxu1 %v990_v55  ;;  %v1159_v2 = vrot.slane %v67_v0, %v1150_v63  ;;  %v1162_v3 = vrot.slane %v67_v0, %v1156_v1 }
  0x4c   :  { %927 = vmatprep.subr.bf16.mxu1 %v995_v57 }
  0x4e   :  { %508 = vmatpush1.bf16.msra.mxu0 %v990_v55 }
  0x4f   :  { %509 = vmatprep.subr.bf16.mxu0 %v995_v57  ;;  %943 = vmatpush1.bf16.msra.mxu1 %v993_v58 }
  0x50   :  { %928 = vmatprep.subr.bf16.mxu1 %v998_v59 }
  0x51   :  { %880 = vmatmul.mubr.msk.bf16.gmra.mrb[28].mxu0 %vm84_vm1, %v65_v56 }
  0x52   :  { %510 = vmatpush1.bf16.msra.mxu0 %v993_v58 }
  0x53   :  { %511 = vmatprep.subr.bf16.mxu0 %v998_v59  ;;  %944 = vmatpush1.bf16.msra.mxu1 %v996_v60 }
  0x56   :  { %512 = vmatpush1.bf16.msra.mxu0 %v996_v60 }
  0xec   :  { %v150_v4 = vpop.f32.mrb[0].mxu0 }
  0xed   :  { %v151_v5 = vadd.f32 %v150_v4, %v1159_v2  ;;  %v152_v6 = vpop.f32.mrb[1].mxu0 }
  0xee   :  { %v153_v7 = vadd.f32 %v152_v6, %v1162_v3  ;;  %v154_v8 = vpop.f32.mrb[2].mxu0 }
  0xef   :  { %v155_v9 = vadd.f32 %v154_v8, %v1159_v2  ;;  %v156_v10 = vpop.f32.mrb[3].mxu0  ;;  %v229_v12 = vmax.f32 %v151_v5, 0.0 }
  0xf0   :  { %v157_v11 = vadd.f32 %v156_v10, %v1162_v3  ;;  %v230_v14 = vmax.f32 %v153_v7, 0.0 }
  0xf1   :  { %v231_v13 = vmax.f32 %v155_v9, 0.0 }
  0xf2   :  { %v232_v15 = vmax.f32 %v157_v11, 0.0 }
  0xf3   :  { %v261_v16 = vpack.c.bf16 %v231_v13, %v229_v12 }
  0xf4   :  { %v262_v17 = vpack.c.bf16 %v232_v15, %v230_v14  ;;  %v160_v18 = vpop.f32.mrb[4].mxu0 }
  0xf5   :  { %v161_v19 = vadd.f32 %v160_v18, %v1159_v2  ;;  %v162_v20 = vpop.f32.mrb[5].mxu0 }
  0xf6   :  { %v163_v21 = vadd.f32 %v162_v20, %v1162_v3  ;;  %v164_v22 = vpop.f32.mrb[6].mxu0  ;;  %513 = vmatprep.mubr.bf16.mxu0 %v262_v17 }
  0xf7   :  { %v165_v23 = vadd.f32 %v164_v22, %v1159_v2  ;;  %v166_v24 = vpop.f32.mrb[7].mxu0  ;;  %514 = vmatmul.mubr.bf16.vlgmr.msra.gmra.mrb[32].mxu0 %v261_v16  ;;  %v233_v26 = vmax.f32 %v161_v19, 0.0 }
  0xf8   :  { %v167_v25 = vadd.f32 %v166_v24, %v1162_v3  ;;  %v234_v28 = vmax.f32 %v163_v21, 0.0 }
  0xf9   :  { %v235_v27 = vmax.f32 %v165_v23, 0.0 }
  0xfa   :  { %v236_v29 = vmax.f32 %v167_v25, 0.0 }
  0xfb   :  { %v263_v30 = vpack.c.bf16 %v235_v27, %v233_v26 }
  0xfc   :  { %v264_v31 = vpack.c.bf16 %v236_v29, %v234_v28  ;;  %v170_v32 = vpop.f32.mrb[8].mxu0 }
  0xfd   :  { %v171_v33 = vadd.f32 %v170_v32, %v1159_v2  ;;  %v172_v34 = vpop.f32.mrb[9].mxu0 }
  0xfe   :  { %v173_v35 = vadd.f32 %v172_v34, %v1162_v3  ;;  %v174_v36 = vpop.f32.mrb[10].mxu0  ;;  %523 = vmatprep.mubr.bf16.mxu0 %v264_v31 }
  0xff   :  { %v175_v37 = vadd.f32 %v174_v36, %v1159_v2  ;;  %v176_v38 = vpop.f32.mrb[11].mxu0  ;;  %524 = vmatmul.mubr.bf16.gmra.mrb[36].mxu0 %v263_v30  ;;  %v237_v40 = vmax.f32 %v171_v33, 0.0 }
 0x100   :  { %v177_v39 = vadd.f32 %v176_v38, %v1162_v3  ;;  %v238_v42 = vmax.f32 %v173_v35, 0.0 }
 0x101   :  { %v239_v41 = vmax.f32 %v175_v37, 0.0 }
 0x102   :  { %v240_v43 = vmax.f32 %v177_v39, 0.0 }
 0x103   :  { %v265_v44 = vpack.c.bf16 %v239_v41, %v237_v40 }
 0x104   :  { %v266_v45 = vpack.c.bf16 %v240_v43, %v238_v42  ;;  %v180_v46 = vpop.f32.mrb[12].mxu0 }
 0x105   :  { %v181_v47 = vadd.f32 %v180_v46, %v1159_v2  ;;  %v182_v48 = vpop.f32.mrb[13].mxu0 }
 0x106   :  { %v183_v49 = vadd.f32 %v182_v48, %v1162_v3  ;;  %v184_v50 = vpop.f32.mrb[14].mxu0  ;;  %533 = vmatprep.mubr.bf16.mxu0 %v266_v45 }
 0x107   :  { %v185_v51 = vadd.f32 %v184_v50, %v1159_v2  ;;  %v186_v52 = vpop.f32.mrb[15].mxu0  ;;  %534 = vmatmul.mubr.bf16.gmra.mrb[40].mxu0 %v265_v44  ;;  %v241_v54 = vmax.f32 %v181_v47, 0.0 }
 0x108   :  { %v187_v53 = vadd.f32 %v186_v52, %v1162_v3  ;;  %v242_v56 = vmax.f32 %v183_v49, 0.0 }
 0x109   :  { %v243_v55 = vmax.f32 %v185_v51, 0.0 }
 0x10a   :  { %v244_v57 = vmax.f32 %v187_v53, 0.0 }
 0x10b   :  { %v267_v58 = vpack.c.bf16 %v243_v55, %v241_v54 }
 0x10c   :  { %v190_v59 = vpop.f32.mrb[16].mxu0  ;;  %v268_v60 = vpack.c.bf16 %v244_v57, %v242_v56 }
 0x10d   :  { %v191_v0 = vadd.f32 %v190_v59, %v1159_v2  ;;  %v192_v4 = vpop.f32.mrb[17].mxu0 }
 0x10e   :  { %v193_v5 = vadd.f32 %v192_v4, %v1162_v3  ;;  %v194_v6 = vpop.f32.mrb[18].mxu0  ;;  %543 = vmatprep.mubr.bf16.mxu1 %v268_v60 }
 0x10f   :  { %v195_v7 = vadd.f32 %v194_v6, %v1159_v2  ;;  %v196_v8 = vpop.f32.mrb[19].mxu0  ;;  %544 = vmatmul.mubr.bf16.vlgmr.msra.gmra.mrb[0].mxu1 %v267_v58  ;;  %v245_v10 = vmax.f32 %v191_v0, 0.0  ;;  %v309_v58 = vld [vmem:[%s1345_s4] sm:$0x3] }
 0x110   :  { %v197_v9 = vadd.f32 %v196_v8, %v1162_v3  ;;  %v246_v12 = vmax.f32 %v193_v5, 0.0  ;;  %v1200_v59 = vrot.slane %v309_v58, %v1150_v63 }
 0x111   :  { %v247_v11 = vmax.f32 %v195_v7, 0.0 }
 0x112   :  { %v248_v13 = vmax.f32 %v197_v9, 0.0 }
 0x113   :  { %v269_v14 = vpack.c.bf16 %v247_v11, %v245_v10 }
 0x114   :  { %v270_v15 = vpack.c.bf16 %v248_v13, %v246_v12  ;;  %v200_v16 = vpop.f32.mrb[20].mxu0 }
 0x115   :  { %v201_v17 = vadd.f32 %v200_v16, %v1159_v2  ;;  %v202_v18 = vpop.f32.mrb[21].mxu0 }
 0x116   :  { %v203_v19 = vadd.f32 %v202_v18, %v1162_v3  ;;  %v204_v20 = vpop.f32.mrb[22].mxu0  ;;  %553 = vmatprep.mubr.bf16.mxu1 %v270_v15 }
 0x117   :  { %v205_v21 = vadd.f32 %v204_v20, %v1159_v2  ;;  %v206_v22 = vpop.f32.mrb[23].mxu0  ;;  %554 = vmatmul.mubr.bf16.gmra.mrb[4].mxu1 %v269_v14  ;;  %v249_v24 = vmax.f32 %v201_v17, 0.0 }
 0x118   :  { %v207_v23 = vadd.f32 %v206_v22, %v1162_v3  ;;  %v250_v26 = vmax.f32 %v203_v19, 0.0 }
 0x119   :  { %v251_v25 = vmax.f32 %v205_v21, 0.0 }
 0x11a   :  { %v252_v27 = vmax.f32 %v207_v23, 0.0 }
 0x11b   :  { %v271_v28 = vpack.c.bf16 %v251_v25, %v249_v24 }
 0x11c   :  { %v272_v29 = vpack.c.bf16 %v252_v27, %v250_v26  ;;  %v210_v30 = vpop.f32.mrb[24].mxu0 }
 0x11d   :  { %v211_v31 = vadd.f32 %v210_v30, %v1159_v2  ;;  %v212_v32 = vpop.f32.mrb[25].mxu0 }
 0x11e   :  { %v213_v33 = vadd.f32 %v212_v32, %v1162_v3  ;;  %v214_v34 = vpop.f32.mrb[26].mxu0  ;;  %563 = vmatprep.mubr.bf16.mxu1 %v272_v29 }
 0x11f   :  { %v215_v35 = vadd.f32 %v214_v34, %v1159_v2  ;;  %v216_v36 = vpop.f32.mrb[27].mxu0  ;;  %564 = vmatmul.mubr.bf16.gmra.mrb[8].mxu1 %v271_v28  ;;  %v253_v38 = vmax.f32 %v211_v31, 0.0 }
 0x120   :  { %v217_v37 = vadd.f32 %v216_v36, %v1162_v3  ;;  %v254_v40 = vmax.f32 %v213_v33, 0.0 }
 0x121   :  { %v255_v39 = vmax.f32 %v215_v35, 0.0 }
 0x122   :  { %v256_v41 = vmax.f32 %v217_v37, 0.0 }
 0x123   :  { %v273_v42 = vpack.c.bf16 %v255_v39, %v253_v38 }
 0x124   :  { %v274_v43 = vpack.c.bf16 %v256_v41, %v254_v40  ;;  %v220_v44 = vpop.f32.mrb[28].mxu0 }
 0x125   :  { %v221_v45 = vadd.f32 %v220_v44, %v1159_v2  ;;  %v222_v46 = vpop.f32.mrb[29].mxu0 }
 0x126   :  { %v223_v47 = vadd.f32 %v222_v46, %v1162_v3  ;;  %v224_v48 = vpop.f32.mrb[30].mxu0  ;;  %573 = vmatprep.mubr.bf16.mxu1 %v274_v43 }
 0x127   :  { %v225_v49 = vadd.f32 %v224_v48, %v1159_v2  ;;  %v226_v50 = vpop.f32.mrb[31].mxu0  ;;  %574 = vmatmul.mubr.bf16.gmra.mrb[12].mxu1 %v273_v42  ;;  %v257_v52 = vmax.f32 %v221_v45, 0.0  ;;  %v1203_v2 = vrot.slane %v309_v58, %v1156_v1 }
 0x128   :  { %v227_v51 = vadd.f32 %v226_v50, %v1162_v3  ;;  %v258_v54 = vmax.f32 %v223_v47, 0.0  ;;  %v626_v3 = vld [vmem:[%s1346_s5] sm:$0x3] }
 0x129   :  { %v259_v53 = vmax.f32 %v225_v49, 0.0  ;;  %v1210_v5 = vrot.slane %v626_v3, %v1150_v63  ;;  %v1214_v8 = vrot.slane %v626_v3, %v1156_v1 }
 0x12a   :  { %v260_v55 = vmax.f32 %v227_v51, 0.0 }
 0x12b   :  { %v275_v56 = vpack.c.bf16 %v259_v53, %v257_v52 }
 0x12c   :  { %v276_v57 = vpack.c.bf16 %v260_v55, %v258_v54 }
 0x12e   :  { %583 = vmatprep.mubr.bf16.mxu1 %v276_v57 }
 0x12f   :  { %584 = vmatmul.mubr.bf16.gmra.mrb[16].mxu1 %v275_v56 }
 0x1ca   :  { %v515_v60 = vpop.f32.mrb[32].mxu0 }
 0x1cb   :  { %v516_v0 = vadd.f32 %v515_v60, %v1200_v59  ;;  %v517_v4 = vpop.f32.mrb[33].mxu0 }
 0x1cc   :  { %v518_v6 = vadd.f32 %v517_v4, %v1203_v2  ;;  %v519_v7 = vpop.f32.mrb[34].mxu0 }
 0x1cd   :  { %v594_v9 = vmax.f32 %v516_v0, 0.0  ;;  %v520_v10 = vadd.f32 %v519_v7, %v1200_v59  ;;  %v521_v11 = vpop.f32.mrb[35].mxu0 }
 0x1ce   :  { %v595_v12 = vmax.f32 %v518_v6, 0.0  ;;  %v522_v13 = vadd.f32 %v521_v11, %v1203_v2 }
 0x1cf   :  { %v596_v14 = vmax.f32 %v520_v10, 0.0  ;;  %v638_v15 = vmul.f32 %v1210_v5, %v594_v9 }
 0x1d0   :  { %v597_v16 = vmax.f32 %v522_v13, 0.0  ;;  %v639_v63 = vmul.f32 %v1214_v8, %v595_v12 }
 0x1d1   :  { %v640_v17 = vmul.f32 %v1210_v5, %v596_v14 }
 0x1d2   :  { %v641_v18 = vmul.f32 %v1214_v8, %v597_v16  ;;  %v525_v19 = vpop.f32.mrb[36].mxu0  ;;  %v670_v1 = vadd.f32 %v639_v63, %v638_v15 }
 0x1d3   :  { %v526_v20 = vadd.f32 %v525_v19, %v1200_v59  ;;  %v527_v21 = vpop.f32.mrb[37].mxu0 }
 0x1d4   :  { %v528_v22 = vadd.f32 %v527_v21, %v1203_v2  ;;  %v529_v23 = vpop.f32.mrb[38].mxu0  ;;  %671 = vadd.xlane.f32.xlu0 %v670_v1  ;;  %v673_v24 = vadd.f32 %v641_v18, %v640_v17 }
 0x1d5   :  { %v598_v25 = vmax.f32 %v526_v20, 0.0  ;;  %v530_v26 = vadd.f32 %v529_v23, %v1200_v59  ;;  %v531_v27 = vpop.f32.mrb[39].mxu0 }
 0x1d6   :  { %v599_v28 = vmax.f32 %v528_v22, 0.0  ;;  %v532_v29 = vadd.f32 %v531_v27, %v1203_v2 }
 0x1d7   :  { %v600_v30 = vmax.f32 %v530_v26, 0.0  ;;  %v642_v31 = vmul.f32 %v1210_v5, %v598_v25 }
 0x1d8   :  { %v601_v32 = vmax.f32 %v532_v29, 0.0  ;;  %674 = vadd.xlane.f32.xlu0 %v673_v24  ;;  %v643_v33 = vmul.f32 %v1214_v8, %v599_v28 }
 0x1d9   :  { %v644_v34 = vmul.f32 %v1210_v5, %v600_v30 }
 0x1da   :  { %v645_v35 = vmul.f32 %v1214_v8, %v601_v32  ;;  %v535_v36 = vpop.f32.mrb[40].mxu0  ;;  %v676_v37 = vadd.f32 %v643_v33, %v642_v31 }
 0x1db   :  { %v536_v38 = vadd.f32 %v535_v36, %v1200_v59  ;;  %v537_v39 = vpop.f32.mrb[41].mxu0 }
 0x1dc   :  { %v538_v40 = vadd.f32 %v537_v39, %v1203_v2  ;;  %v539_v41 = vpop.f32.mrb[42].mxu0  ;;  %677 = vadd.xlane.f32.xlu1 %v676_v37  ;;  %v679_v42 = vadd.f32 %v645_v35, %v644_v34 }
 0x1dd   :  { %v602_v43 = vmax.f32 %v536_v38, 0.0  ;;  %v540_v44 = vadd.f32 %v539_v41, %v1200_v59  ;;  %v541_v45 = vpop.f32.mrb[43].mxu0 }
 0x1de   :  { %v603_v46 = vmax.f32 %v538_v40, 0.0  ;;  %v542_v47 = vadd.f32 %v541_v45, %v1203_v2 }
 0x1df   :  { %v646_v48 = vmul.f32 %v1210_v5, %v602_v43  ;;  %v604_v49 = vmax.f32 %v540_v44, 0.0 }
 0x1e0   :  { %v647_v50 = vmul.f32 %v1214_v8, %v603_v46  ;;  %v605_v51 = vmax.f32 %v542_v47, 0.0  ;;  %680 = vadd.xlane.f32.xlu1 %v679_v42 }
 0x1e1   :  { %v648_v52 = vmul.f32 %v1210_v5, %v604_v49 }
 0x1e2   :  { %v649_v53 = vmul.f32 %v1214_v8, %v605_v51  ;;  %v545_v54 = vpop.f32.mrb[0].mxu1  ;;  %v682_v55 = vadd.f32 %v647_v50, %v646_v48 }
 0x1e3   :  { %v546_v56 = vadd.f32 %v545_v54, %v1200_v59  ;;  %v547_v57 = vpop.f32.mrb[1].mxu1 }
 0x1e4   :  { %v548_v58 = vadd.f32 %v547_v57, %v1203_v2  ;;  %v549_v3 = vpop.f32.mrb[2].mxu1  ;;  %683 = vadd.xlane.f32.xlu0 %v682_v55  ;;  %v685_v60 = vadd.f32 %v649_v53, %v648_v52 }
 0x1e5   :  { %v606_v0 = vmax.f32 %v546_v56, 0.0  ;;  %v550_v4 = vadd.f32 %v549_v3, %v1200_v59  ;;  %v551_v6 = vpop.f32.mrb[3].mxu1 }
 0x1e6   :  { %v607_v7 = vmax.f32 %v548_v58, 0.0  ;;  %v552_v9 = vadd.f32 %v551_v6, %v1203_v2  ;;  %686 = vadd.xlane.f32.xlu1 %v685_v60 }
 0x1e7   :  { %v650_v10 = vmul.f32 %v1210_v5, %v606_v0  ;;  %v608_v11 = vmax.f32 %v550_v4, 0.0 }
 0x1e8   :  { %v651_v12 = vmul.f32 %v1214_v8, %v607_v7  ;;  %v609_v13 = vmax.f32 %v552_v9, 0.0 }
 0x1e9   :  { %v652_v14 = vmul.f32 %v1210_v5, %v608_v11 }
 0x1ea   :  { %v653_v15 = vmul.f32 %v1214_v8, %v609_v13  ;;  %v555_v16 = vpop.f32.mrb[4].mxu1  ;;  %v688_v63 = vadd.f32 %v651_v12, %v650_v10 }
 0x1eb   :  { %v556_v17 = vadd.f32 %v555_v16, %v1200_v59  ;;  %v557_v18 = vpop.f32.mrb[5].mxu1 }
 0x1ec   :  { %v558_v19 = vadd.f32 %v557_v18, %v1203_v2  ;;  %v559_v1 = vpop.f32.mrb[6].mxu1  ;;  %689 = vadd.xlane.f32.xlu0 %v688_v63  ;;  %v691_v20 = vadd.f32 %v653_v15, %v652_v14 }
 0x1ed   :  { %v610_v21 = vmax.f32 %v556_v17, 0.0  ;;  %v560_v22 = vadd.f32 %v559_v1, %v1200_v59  ;;  %v561_v23 = vpop.f32.mrb[7].mxu1 }
 0x1ee   :  { %v611_v24 = vmax.f32 %v558_v19, 0.0  ;;  %v562_v25 = vadd.f32 %v561_v23, %v1203_v2  ;;  %692 = vadd.xlane.f32.xlu1 %v691_v20 }
 0x1ef   :  { %v654_v26 = vmul.f32 %v1210_v5, %v610_v21  ;;  %v612_v27 = vmax.f32 %v560_v22, 0.0 }
 0x1f0   :  { %v655_v28 = vmul.f32 %v1214_v8, %v611_v24  ;;  %v613_v29 = vmax.f32 %v562_v25, 0.0 }
 0x1f1   :  { %v656_v30 = vmul.f32 %v1210_v5, %v612_v27 }
 0x1f2   :  { %v657_v31 = vmul.f32 %v1214_v8, %v613_v29  ;;  %v565_v32 = vpop.f32.mrb[8].mxu1  ;;  %v694_v33 = vadd.f32 %v655_v28, %v654_v26 }
 0x1f3   :  { %v566_v34 = vadd.f32 %v565_v32, %v1200_v59  ;;  %v567_v35 = vpop.f32.mrb[9].mxu1 }
 0x1f4   :  { %v568_v36 = vadd.f32 %v567_v35, %v1203_v2  ;;  %v569_v37 = vpop.f32.mrb[10].mxu1  ;;  %695 = vadd.xlane.f32.xlu0 %v694_v33  ;;  %v697_v38 = vadd.f32 %v657_v31, %v656_v30  ;;  %v1279_v31 = vand.u32 127, %v69_v61 }
 0x1f5   :  { %v614_v39 = vmax.f32 %v566_v34, 0.0  ;;  %v570_v40 = vadd.f32 %v569_v37, %v1200_v59  ;;  %v571_v41 = vpop.f32.mrb[11].mxu1 }
 0x1f6   :  { %v615_v42 = vmax.f32 %v568_v36, 0.0  ;;  %v572_v43 = vadd.f32 %v571_v41, %v1203_v2  ;;  %698 = vadd.xlane.f32.xlu1 %v697_v38  ;;  %v765_v33 = vadd.s32 4294967280, %v1279_v31  ;;  %v772_v34 = vadd.s32 4294967272, %v1279_v31 }
 0x1f7   :  { %v658_v44 = vmul.f32 %v1210_v5, %v614_v39  ;;  %v616_v45 = vmax.f32 %v570_v40, 0.0  ;;  %v779_v35 = vadd.s32 4294967264, %v1279_v31  ;;  %v756_v38 = vsub.s32 %v1279_v31, %v1147_v62 }
 0x1f8   :  { %v659_v46 = vmul.f32 %v1214_v8, %v615_v42  ;;  %v617_v47 = vmax.f32 %v572_v43, 0.0  ;;  %v768_v39 = vsub.s32 %v765_v33, %v1147_v62  ;;  %v775_v42 = vsub.s32 %v772_v34, %v1147_v62 }
 0x1f9   :  { %v660_v48 = vmul.f32 %v1210_v5, %v616_v45  ;;  %v782_v45 = vsub.s32 %v779_v35, %v1147_v62  ;;  %v842_v34 = vadd.s32 4294967192, %v1279_v31 }
 0x1fa   :  { %v661_v49 = vmul.f32 %v1214_v8, %v617_v47  ;;  %v575_v50 = vpop.f32.mrb[12].mxu1  ;;  %v700_v51 = vadd.f32 %v659_v46, %v658_v44  ;;  %v786_v44 = vadd.s32 4294967256, %v1279_v31 }
 0x1fb   :  { %v576_v52 = vadd.f32 %v575_v50, %v1200_v59  ;;  %v577_v53 = vpop.f32.mrb[13].mxu1 }
 0x1fc   :  { %v578_v54 = vadd.f32 %v577_v53, %v1203_v2  ;;  %v579_v55 = vpop.f32.mrb[14].mxu1  ;;  %701 = vadd.xlane.f32.xlu0 %v700_v51  ;;  %v703_v56 = vadd.f32 %v661_v49, %v660_v48  ;;  %v793_v48 = vadd.s32 4294967248, %v1279_v31 }
 0x1fd   :  { %v618_v57 = vmax.f32 %v576_v52, 0.0  ;;  %v580_v58 = vadd.f32 %v579_v55, %v1200_v59  ;;  %v581_v3 = vpop.f32.mrb[15].mxu1  ;;  %v800_v52 = vadd.s32 4294967240, %v1279_v31  ;;  %v789_v55 = vsub.s32 %v786_v44, %v1147_v62 }
 0x1fe   :  { %v619_v60 = vmax.f32 %v578_v54, 0.0  ;;  %v582_v0 = vadd.f32 %v581_v3, %v1203_v2  ;;  %704 = vadd.xlane.f32.xlu1 %v703_v56 }
 0x1ff   :  { %v662_v4 = vmul.f32 %v1210_v5, %v618_v57  ;;  %v620_v6 = vmax.f32 %v580_v58, 0.0  ;;  %v796_v58 = vsub.s32 %v793_v48, %v1147_v62 }
 0x200   :  { %v663_v7 = vmul.f32 %v1214_v8, %v619_v60  ;;  %v621_v9 = vmax.f32 %v582_v0, 0.0  ;;  %v807_v0 = vadd.s32 4294967232, %v1279_v31 }
 0x201   :  { %v664_v10 = vmul.f32 %v1210_v5, %v620_v6 }
 0x202   :  { %v665_v11 = vmul.f32 %v1214_v8, %v621_v9  ;;  %v585_v12 = vpop.f32.mrb[16].mxu1  ;;  %v706_v13 = vadd.f32 %v663_v7, %v662_v4  ;;  %v803_v9 = vsub.s32 %v800_v52, %v1147_v62 }
 0x203   :  { %v586_v14 = vadd.f32 %v585_v12, %v1200_v59  ;;  %v587_v15 = vpop.f32.mrb[17].mxu1 }
 0x204   :  { %v588_v16 = vadd.f32 %v587_v15, %v1203_v2  ;;  %v589_v63 = vpop.f32.mrb[18].mxu1  ;;  %707 = vadd.xlane.f32.xlu0 %v706_v13  ;;  %v709_v17 = vadd.f32 %v665_v11, %v664_v10  ;;  %v814_v10 = vadd.s32 4294967224, %v1279_v31 }
 0x205   :  { %v622_v18 = vmax.f32 %v586_v14, 0.0  ;;  %v590_v19 = vadd.f32 %v589_v63, %v1200_v59  ;;  %v591_v1 = vpop.f32.mrb[19].mxu1  ;;  %v821_v14 = vadd.s32 4294967216, %v1279_v31  ;;  %v810_v63 = vsub.s32 %v807_v0, %v1147_v62 }
 0x206   :  { %v623_v20 = vmax.f32 %v588_v16, 0.0  ;;  %v592_v21 = vadd.f32 %v591_v1, %v1203_v2  ;;  %710 = vadd.xlane.f32.xlu1 %v709_v17  ;;  %v758_v2 = vadd.s32 4294967288, %v1279_v31  ;;  %v817_v1 = vsub.s32 %v814_v10, %v1147_v62 }
 0x207   :  { %v666_v22 = vmul.f32 %v1210_v5, %v622_v18  ;;  %v624_v23 = vmax.f32 %v590_v19, 0.0 }
 0x208   :  { %v667_v24 = vmul.f32 %v1214_v8, %v623_v20  ;;  %v625_v25 = vmax.f32 %v592_v21, 0.0  ;;  %v761_v36 = vsub.s32 %v758_v2, %v1147_v62  ;;  %v828_v20 = vadd.s32 4294967208, %v1279_v31 }
 0x209   :  { %v668_v26 = vmul.f32 %v1210_v5, %v624_v23  ;;  %v1287_v5 = vstv %s1347_s6 }
 0x20a   :  { %v669_v27 = vmul.f32 %v1214_v8, %v625_v25  ;;  %v712_v28 = vadd.f32 %v667_v24, %v666_v22  ;;  %v824_v24 = vsub.s32 %v821_v14, %v1147_v62 }
 0x20c   :  { %713 = vadd.xlane.f32.xlu0 %v712_v28  ;;  %v715_v29 = vadd.f32 %v669_v27, %v668_v26 }
 0x20e   :  { %716 = vadd.xlane.f32.xlu1 %v715_v29  ;;  %v835_v29 = vadd.s32 4294967200, %v1279_v31 }
 0x261   :  { %v672_v59 = vpop.xlane.xlu0 %671 }
 0x262   :  { %v720_v41 = vadd.f32 %v1287_v5, %v672_v59  ;;  %v831_v59 = vsub.s32 %v828_v20, %v1147_v62 }
 0x264   :  { %v757_v53 = vrot.slane %v720_v41, %v756_v38  ;;  %v849_v38 = vadd.s32 4294967184, %v1279_v31  ;;  %v845_v41 = vsub.s32 %v842_v34, %v1147_v62 }
 0x265   :  { %v675_v32 = vpop.xlane.xlu0 %674 }
 0x266   :  { %v721_v61 = vadd.f32 %v1287_v5, %v675_v32 }
 0x268   :  { %v762_v49 = vrot.slane %v721_v61, %v761_v36  ;;  %v838_v36 = vsub.s32 %v835_v29, %v1147_v62 }
 0x269   :  { %v678_v30 = vpop.xlane.xlu1 %677 }
 0x26a   :  { %v722_v40 = vadd.f32 %v1287_v5, %v678_v30  ;;  %v764_v4 = vsel %vm763_vm2, %v762_v49, %v757_v53 }
 0x26c   :  { %v769_v51 = vrot.slane %v722_v40, %v768_v39 }
 0x26d   :  { %v681_v8 = vpop.xlane.xlu1 %680 }
 0x26e   :  { %v723_v43 = vadd.f32 %v1287_v5, %v681_v8  ;;  %v771_v7 = vsel %vm770_vm3, %v769_v51, %v764_v4 }
 0x270   :  { %v776_v54 = vrot.slane %v723_v43, %v775_v42 }
 0x271   :  { %v684_v37 = vpop.xlane.xlu0 %683 }
 0x272   :  { %v724_v46 = vadd.f32 %v1287_v5, %v684_v37  ;;  %v778_v11 = vsel %vm777_vm4, %v776_v54, %v771_v7 }
 0x273   :  { %v687_v47 = vpop.xlane.xlu1 %686 }
 0x274   :  { %v725_v56 = vadd.f32 %v1287_v5, %v687_v47  ;;  %v783_v57 = vrot.slane %v724_v46, %v782_v45  ;;  %v856_v45 = vadd.s32 4294967176, %v1279_v31  ;;  %v852_v46 = vsub.s32 %v849_v38, %v1147_v62 }
 0x276   :  { %v790_v12 = vrot.slane %v725_v56, %v789_v55  ;;  %v785_v15 = vsel %vm784_vm5, %v783_v57, %v778_v11  ;;  %v859_v52 = vsub.s32 %v856_v45, %v1147_v62 }
 0x278   :  { %v792_v21 = vsel %vm791_vm6, %v790_v12, %v785_v15 }
 0x279   :  { %v690_v50 = vpop.xlane.xlu0 %689 }
 0x27a   :  { %v726_v3 = vadd.f32 %v1287_v5, %v690_v50 }
 0x27b   :  { %v693_v60 = vpop.xlane.xlu1 %692 }
 0x27c   :  { %v727_v13 = vadd.f32 %v1287_v5, %v693_v60  ;;  %v797_v16 = vrot.slane %v726_v3, %v796_v58 }
 0x27e   :  { %v804_v22 = vrot.slane %v727_v13, %v803_v9  ;;  %v799_v25 = vsel %vm798_vm7, %v797_v16, %v792_v21 }
 0x280   :  { %v806_v30 = vsel %vm805_vm8, %v804_v22, %v799_v25 }
 0x281   :  { %v696_v6 = vpop.xlane.xlu0 %695 }
 0x282   :  { %v728_v17 = vadd.f32 %v1287_v5, %v696_v6 }
 0x283   :  { %v699_v18 = vpop.xlane.xlu1 %698 }
 0x284   :  { %v729_v23 = vadd.f32 %v1287_v5, %v699_v18  ;;  %v811_v26 = vrot.slane %v728_v17, %v810_v63 }
 0x286   :  { %v818_v2 = vrot.slane %v729_v23, %v817_v1  ;;  %v813_v8 = vsel %vm812_vm9, %v811_v26, %v806_v30 }
 0x288   :  { %v820_v39 = vsel %vm819_vm10, %v818_v2, %v813_v8 }
 0x289   :  { %v702_v19 = vpop.xlane.xlu0 %701 }
 0x28a   :  { %v730_v27 = vadd.f32 %v1287_v5, %v702_v19 }
 0x28b   :  { %v705_v28 = vpop.xlane.xlu1 %704 }
 0x28c   :  { %v731_v32 = vadd.f32 %v1287_v5, %v705_v28  ;;  %v825_v35 = vrot.slane %v730_v27, %v824_v24 }
 0x28e   :  { %v832_v40 = vrot.slane %v731_v32, %v831_v59  ;;  %v827_v43 = vsel %vm826_vm11, %v825_v35, %v820_v39 }
 0x290   :  { %v834_v47 = vsel %vm833_vm12, %v832_v40, %v827_v43 }
 0x291   :  { %v708_v33 = vpop.xlane.xlu0 %707 }
 0x292   :  { %v732_v61 = vadd.f32 %v1287_v5, %v708_v33 }
 0x293   :  { %v711_v37 = vpop.xlane.xlu1 %710 }
 0x294   :  { %v733_v42 = vadd.f32 %v1287_v5, %v711_v37  ;;  %v839_v44 = vrot.slane %v732_v61, %v838_v36 }
 0x296   :  { %v846_v48 = vrot.slane %v733_v42, %v845_v41  ;;  %v841_v50 = vsel %vm840_vm13, %v839_v44, %v834_v47 }
 0x298   :  { %v848_v56 = vsel %vm847_vm14, %v846_v48, %v841_v50 }
 0x299   :  { %v714_v49 = vpop.xlane.xlu0 %713 }
 0x29a   :  { %v734_v51 = vadd.f32 %v1287_v5, %v714_v49 }
 0x29b   :  { %v717_v53 = vpop.xlane.xlu1 %716 }
 0x29c   :  { %v853_v54 = vrot.slane %v734_v51, %v852_v46  ;;  %v735_v55 = vadd.f32 %v1287_v5, %v717_v53 }
 0x29e   :  { %v855_v31 = vsel %vm854_vm15, %v853_v54, %v848_v56  ;;  %v860_v57 = vrot.slane %v735_v55, %v859_v52 }
 0x2a0   :  { %v862_v58 = vsel %vm861_vm0, %v860_v57, %v855_v31 }
 0x2a1   :  { %864 = vst [vmem:[%s1348_s7] sm:$0x1] %v862_v58 }
 0x2a2   :  { %869 = vsyncpa [#allocation4], 1 }

</bundles_post_ra>
